<compile_context>
chip_gen: v7x
topology: tpu7x:2x2x1
jax: 0.10.0
libtpu: 0.0.40
codegen_flags: <defaults>
</compile_context>

<pallas_src>
import jax
import jax.numpy as jnp
from jax.experimental import pallas as pl
from jax.experimental.pallas import tpu as pltpu

_LANE = 128


def bc_kernel(x_ref,
              w1_ref, b1_ref,
              w2_ref, b2_ref,
              w3_ref, b3_ref,
              w4_ref, b4_ref,
              o_ref):
    actn_dim = o_ref.shape[-1]

    # fc1 + ReLU (bf16 MXU matmul, f32 accumulate)
    h = jnp.dot(x_ref[...], w1_ref[...], preferred_element_type=jnp.float32)
    h = jnp.maximum(h + b1_ref[...], 0.0)
    # fc2 + ReLU
    h = jnp.dot(h.astype(jnp.bfloat16), w2_ref[...],
                preferred_element_type=jnp.float32)
    h = jnp.maximum(h + b2_ref[...], 0.0)
    # fc3 + ReLU (output width zero-padded to 128 lanes -> lane-dense h3)
    h = jnp.dot(h.astype(jnp.bfloat16), w3_ref[...],
                preferred_element_type=jnp.float32)
    h = jnp.maximum(h + b3_ref[...], 0.0)
    # fc4 (no activation). w4/b4 are zero-padded to a lane-dense multiple-of-
    # 128 output width for the matmul; only the real actn_dim columns are
    # stored (small writeback, masked vst cost hidden under the MXU).
    h = jnp.dot(h.astype(jnp.bfloat16), w4_ref[...],
                preferred_element_type=jnp.float32)
    h = h + b4_ref[...]
    o_ref[...] = h[:, :actn_dim].astype(o_ref.dtype)


def _round_up(v, m):
    return ((v + m - 1) // m) * m


def _pick_tile_b(B):
    """Batch-tile policy (chip-agnostic).

    Large tiles amortize the ~0.35us per-grid-step overhead and the per-step
    MXU weight pushes; working set at tile_b=1024 is only ~2 MiB, far under
    every generation's VMEM. For B >= 512 we force >= 2 grid steps so the
    'parallel' batch axis can shard across v7x's two TensorCores; the extra
    step is negligible on single-TC chips (v5e/v6e).
    """
    cap = 1024
    if B > cap:
        return cap
    if B >= 512:
        return _round_up(pl.cdiv(B, 2), 8)
    return B


def bc_forward(x, params, *, tile_b=None):
    """Fused 4-layer MLP forward pass (Linear->ReLU x3, Linear)."""
    (w1, b1), (w2, b2), (w3, b3), (w4, b4) = params
    B, ops_dim = x.shape
    actn_dim = w4.shape[1]
    out_dtype = x.dtype

    if tile_b is None:
        tile_b = _pick_tile_b(B)
    grid = (pl.cdiv(B, tile_b),)

    # --- Lane-pad the narrow layer-3 width (64 -> 128): zero output columns
    # of w3 / entries of b3 and zero input rows of w4 (numerically exact).
    h3 = w3.shape[1]
    h3p = _round_up(h3, _LANE)
    if h3p != h3:
        w3 = jnp.pad(w3, ((0, 0), (0, h3p - h3)))
        b3 = jnp.pad(b3, ((0, 0), (0, h3p - h3)))
        w4 = jnp.pad(w4, ((0, h3p - h3), (0, 0)))

    # --- Lane-pad the final matmul's output width for dense compute; the
    # kernel only stores the first actn_dim columns so HBM writeback stays
    # (B, actn_dim).
    n_pad = _round_up(actn_dim, _LANE)
    if n_pad != actn_dim:
        w4 = jnp.pad(w4, ((0, 0), (0, n_pad - actn_dim)))
        b4 = jnp.pad(b4, ((0, 0), (0, n_pad - actn_dim)))

    # --- bf16 MXU inputs (weights + x tile); biases/accumulation stay f32.
    bf16 = jnp.bfloat16
    x_bf = x.astype(bf16)
    w1, w2, w3, w4 = (w.astype(bf16) for w in (w1, w2, w3, w4))
    b1, b2, b3, b4 = (b.astype(jnp.float32) for b in (b1, b2, b3, b4))

    # Grid-invariant weights/biases: whole arrays resident in VMEM,
    # single-buffered (no 2x double-buffer allocation, no per-step re-DMA).
    vmem_full = pl.BlockSpec(memory_space=pltpu.MemorySpace.VMEM)
    weight_specs = [vmem_full] * 8

    out = pl.pallas_call(
        bc_kernel,
        out_shape=jax.ShapeDtypeStruct((B, actn_dim), out_dtype),
        grid=grid,
        in_specs=[pl.BlockSpec((tile_b, ops_dim), lambda i: (i, 0))]
                 + weight_specs,
        out_specs=pl.BlockSpec((tile_b, actn_dim), lambda i: (i, 0)),
        compiler_params=pltpu.CompilerParams(
            dimension_semantics=("parallel",)),
    )(x_bf, w1, b1, w2, b2, w3, b3, w4, b4)

    return out


def init_bc_params(key, ops_dim, actn_dim, dtype=jnp.float32):
    """Deterministic init matching the BC module layer shapes.

    Weights stored as [in, out] (transpose of torch's [out, in]); biases as
    [1, out] for clean 2D broadcasting inside the kernel.
    """
    dims = [ops_dim, 256, 128, 64, actn_dim]
    params = []
    for i in range(4):
        key, kw, kb = jax.random.split(key, 3)
        fan_in = dims[i]
        bound = 1.0 / jnp.sqrt(fan_in)
        w = jax.random.uniform(kw, (dims[i], dims[i + 1]),
                               minval=-bound, maxval=bound, dtype=dtype)
        b = jax.random.uniform(kb, (1, dims[i + 1]),
                               minval=-bound, maxval=bound, dtype=dtype)
        params.append((w, b))
    return params


def bc_forward_ref(x, params):
    """Plain-JAX (f32) reference of the PyTorch forward."""
    (w1, b1), (w2, b2), (w3, b3), (w4, b4) = params
    h = jnp.maximum(x @ w1 + b1, 0.0)
    h = jnp.maximum(h @ w2 + b2, 0.0)
    h = jnp.maximum(h @ w3 + b3, 0.0)
    return h @ w4 + b4


if __name__ == "__main__":
    key = jax.random.PRNGKey(0)
    k_x, k_p = jax.random.split(key)

    batch = 8
    ops_dim = 32
    actn_dim = 8

    x = jax.random.normal(k_x, (batch, ops_dim), dtype=jnp.float32)
    params = init_bc_params(k_p, ops_dim, actn_dim)

    out = bc_forward(x, params)
    out = jax.block_until_ready(out)

    ref = bc_forward_ref(x, params)
    assert out.shape == (batch, actn_dim)
    # bf16 MXU inputs (f32 accumulate) -> loosened tolerance vs f32 reference.
    assert jnp.allclose(out, ref, atol=5e-2, rtol=5e-2)

    print("KERNEL_OK")
</pallas_src>

<mosaic_0001>
module attributes {stable_mosaic.version = 11 : i64} {
  func.func @bc_kernel(%arg0: i32, %arg1: memref<8x32xbf16, #tpu.memory_space<vmem>>, %arg2: memref<32x256xbf16, #tpu.memory_space<vmem>>, %arg3: memref<1x256xf32, #tpu.memory_space<vmem>>, %arg4: memref<256x128xbf16, #tpu.memory_space<vmem>>, %arg5: memref<1x128xf32, #tpu.memory_space<vmem>>, %arg6: memref<128x128xbf16, #tpu.memory_space<vmem>>, %arg7: memref<1x128xf32, #tpu.memory_space<vmem>>, %arg8: memref<128x128xbf16, #tpu.memory_space<vmem>>, %arg9: memref<1x128xf32, #tpu.memory_space<vmem>>, %arg10: memref<8x8xf32, #tpu.memory_space<vmem>>) attributes {dimension_semantics = [#tpu.dimension_semantics<parallel>], iteration_bounds = array<i64: 1>, scalar_prefetch = 0 : i64, scratch_operands = 0 : i64, tpu.core_type = #tpu.core_type<tc>, window_params = [{transform_indices = @transform_0, window_bounds = array<i64: 8, 32>}, {pipeline_mode = #tpu.pipeline_mode<synchronous>, transform_indices = @transform_1, window_bounds = array<i64: 32, 256>}, {pipeline_mode = #tpu.pipeline_mode<synchronous>, transform_indices = @transform_2, window_bounds = array<i64: 1, 256>}, {pipeline_mode = #tpu.pipeline_mode<synchronous>, transform_indices = @transform_3, window_bounds = array<i64: 256, 128>}, {pipeline_mode = #tpu.pipeline_mode<synchronous>, transform_indices = @transform_4, window_bounds = array<i64: 1, 128>}, {pipeline_mode = #tpu.pipeline_mode<synchronous>, transform_indices = @transform_5, window_bounds = array<i64: 128, 128>}, {pipeline_mode = #tpu.pipeline_mode<synchronous>, transform_indices = @transform_6, window_bounds = array<i64: 1, 128>}, {pipeline_mode = #tpu.pipeline_mode<synchronous>, transform_indices = @transform_7, window_bounds = array<i64: 128, 128>}, {pipeline_mode = #tpu.pipeline_mode<synchronous>, transform_indices = @transform_8, window_bounds = array<i64: 1, 128>}, {transform_indices = @transform_9, window_bounds = array<i64: 8, 8>}]} {
    %c0 = arith.constant 0 : index
    %c0_0 = arith.constant 0 : index
    %0 = vector.load %arg1[%c0, %c0_0] : memref<8x32xbf16, #tpu.memory_space<vmem>>, vector<8x32xbf16>
    %c0_1 = arith.constant 0 : index
    %c0_2 = arith.constant 0 : index
    %1 = vector.load %arg2[%c0_1, %c0_2] : memref<32x256xbf16, #tpu.memory_space<vmem>>, vector<32x256xbf16>
    %cst = arith.constant dense<0.000000e+00> : vector<8x256xf32>
    %2 = tpu.matmul %0, %1, %cst {dimension_numbers = #tpu.dot_dimension_numbers<[1], [0], [0], [1], [0, 0, 1, 1], [], []>} : vector<8x32xbf16>, vector<32x256xbf16>, vector<8x256xf32> -> vector<8x256xf32>
    %c0_3 = arith.constant 0 : index
    %c0_4 = arith.constant 0 : index
    %3 = vector.load %arg3[%c0_3, %c0_4] : memref<1x256xf32, #tpu.memory_space<vmem>>, vector<1x256xf32>
    %4 = vector.broadcast %3 : vector<1x256xf32> to vector<8x256xf32>
    %5 = arith.addf %2, %4 : vector<8x256xf32>
    %cst_5 = arith.constant 0.000000e+00 : f32
    %6 = vector.broadcast %cst_5 : f32 to vector<8x256xf32>
    %7 = arith.maximumf %5, %6 : vector<8x256xf32>
    %8 = arith.truncf %7 : vector<8x256xf32> to vector<8x256xbf16>
    %c0_6 = arith.constant 0 : index
    %c0_7 = arith.constant 0 : index
    %9 = vector.load %arg4[%c0_6, %c0_7] : memref<256x128xbf16, #tpu.memory_space<vmem>>, vector<256x128xbf16>
    %cst_8 = arith.constant dense<0.000000e+00> : vector<8x128xf32>
    %10 = tpu.matmul %8, %9, %cst_8 {dimension_numbers = #tpu.dot_dimension_numbers<[1], [0], [0], [1], [0, 0, 1, 1], [], []>} : vector<8x256xbf16>, vector<256x128xbf16>, vector<8x128xf32> -> vector<8x128xf32>
    %c0_9 = arith.constant 0 : index
    %c0_10 = arith.constant 0 : index
    %11 = vector.load %arg5[%c0_9, %c0_10] : memref<1x128xf32, #tpu.memory_space<vmem>>, vector<1x128xf32>
    %12 = vector.broadcast %11 : vector<1x128xf32> to vector<8x128xf32>
    %13 = arith.addf %10, %12 : vector<8x128xf32>
    %cst_11 = arith.constant 0.000000e+00 : f32
    %14 = vector.broadcast %cst_11 : f32 to vector<8x128xf32>
    %15 = arith.maximumf %13, %14 : vector<8x128xf32>
    %16 = arith.truncf %15 : vector<8x128xf32> to vector<8x128xbf16>
    %c0_12 = arith.constant 0 : index
    %c0_13 = arith.constant 0 : index
    %17 = vector.load %arg6[%c0_12, %c0_13] : memref<128x128xbf16, #tpu.memory_space<vmem>>, vector<128x128xbf16>
    %cst_14 = arith.constant dense<0.000000e+00> : vector<8x128xf32>
    %18 = tpu.matmul %16, %17, %cst_14 {dimension_numbers = #tpu.dot_dimension_numbers<[1], [0], [0], [1], [0, 0, 1, 1], [], []>} : vector<8x128xbf16>, vector<128x128xbf16>, vector<8x128xf32> -> vector<8x128xf32>
    %c0_15 = arith.constant 0 : index
    %c0_16 = arith.constant 0 : index
    %19 = vector.load %arg7[%c0_15, %c0_16] : memref<1x128xf32, #tpu.memory_space<vmem>>, vector<1x128xf32>
    %20 = vector.broadcast %19 : vector<1x128xf32> to vector<8x128xf32>
    %21 = arith.addf %18, %20 : vector<8x128xf32>
    %cst_17 = arith.constant 0.000000e+00 : f32
    %22 = vector.broadcast %cst_17 : f32 to vector<8x128xf32>
    %23 = arith.maximumf %21, %22 : vector<8x128xf32>
    %24 = arith.truncf %23 : vector<8x128xf32> to vector<8x128xbf16>
    %c0_18 = arith.constant 0 : index
    %c0_19 = arith.constant 0 : index
    %25 = vector.load %arg8[%c0_18, %c0_19] : memref<128x128xbf16, #tpu.memory_space<vmem>>, vector<128x128xbf16>
    %cst_20 = arith.constant dense<0.000000e+00> : vector<8x128xf32>
    %26 = tpu.matmul %24, %25, %cst_20 {dimension_numbers = #tpu.dot_dimension_numbers<[1], [0], [0], [1], [0, 0, 1, 1], [], []>} : vector<8x128xbf16>, vector<128x128xbf16>, vector<8x128xf32> -> vector<8x128xf32>
    %c0_21 = arith.constant 0 : index
    %c0_22 = arith.constant 0 : index
    %27 = vector.load %arg9[%c0_21, %c0_22] : memref<1x128xf32, #tpu.memory_space<vmem>>, vector<1x128xf32>
    %28 = vector.broadcast %27 : vector<1x128xf32> to vector<8x128xf32>
    %29 = arith.addf %26, %28 : vector<8x128xf32>
    %30 = vector.extract_strided_slice %29 {offsets = [0, 0], sizes = [8, 8], strides = [1, 1]} : vector<8x128xf32> to vector<8x8xf32>
    %c0_23 = arith.constant 0 : index
    %c0_24 = arith.constant 0 : index
    %31 = vector.load %arg10[%c0_23, %c0_24] : memref<8x8xf32, #tpu.memory_space<vmem>>, vector<8x8xf32>
    tpu.vector_store %arg10[%c0_23, %c0_24], %30 {strides = array<i32>} : memref<8x8xf32, #tpu.memory_space<vmem>>, vector<8x8xf32>,
    return
  }
  func.func @transform_0(%arg0: i32) -> (i32, i32) {
    %c0_i32 = arith.constant 0 : i32
    %c0_i32_0 = arith.constant 0 : i32
    return %arg0, %c0_i32 : i32, i32
  }
  func.func @transform_1(%arg0: i32) -> (i32, i32) {
    %c0_i32 = arith.constant 0 : i32
    %c0_i32_0 = arith.constant 0 : i32
    %c0_i32_1 = arith.constant 0 : i32
    return %c0_i32, %c0_i32_0 : i32, i32
  }
  func.func @transform_2(%arg0: i32) -> (i32, i32) {
    %c0_i32 = arith.constant 0 : i32
    %c0_i32_0 = arith.constant 0 : i32
    %c0_i32_1 = arith.constant 0 : i32
    return %c0_i32, %c0_i32_0 : i32, i32
  }
  func.func @transform_3(%arg0: i32) -> (i32, i32) {
    %c0_i32 = arith.constant 0 : i32
    %c0_i32_0 = arith.constant 0 : i32
    %c0_i32_1 = arith.constant 0 : i32
    return %c0_i32, %c0_i32_0 : i32, i32
  }
  func.func @transform_4(%arg0: i32) -> (i32, i32) {
    %c0_i32 = arith.constant 0 : i32
    %c0_i32_0 = arith.constant 0 : i32
    %c0_i32_1 = arith.constant 0 : i32
    return %c0_i32, %c0_i32_0 : i32, i32
  }
  func.func @transform_5(%arg0: i32) -> (i32, i32) {
    %c0_i32 = arith.constant 0 : i32
    %c0_i32_0 = arith.constant 0 : i32
    %c0_i32_1 = arith.constant 0 : i32
    return %c0_i32, %c0_i32_0 : i32, i32
  }
  func.func @transform_6(%arg0: i32) -> (i32, i32) {
    %c0_i32 = arith.constant 0 : i32
    %c0_i32_0 = arith.constant 0 : i32
    %c0_i32_1 = arith.constant 0 : i32
    return %c0_i32, %c0_i32_0 : i32, i32
  }
  func.func @transform_7(%arg0: i32) -> (i32, i32) {
    %c0_i32 = arith.constant 0 : i32
    %c0_i32_0 = arith.constant 0 : i32
    %c0_i32_1 = arith.constant 0 : i32
    return %c0_i32, %c0_i32_0 : i32, i32
  }
  func.func @transform_8(%arg0: i32) -> (i32, i32) {
    %c0_i32 = arith.constant 0 : i32
    %c0_i32_0 = arith.constant 0 : i32
    %c0_i32_1 = arith.constant 0 : i32
    return %c0_i32, %c0_i32_0 : i32, i32
  }
  func.func @transform_9(%arg0: i32) -> (i32, i32) {
    %c0_i32 = arith.constant 0 : i32
    %c0_i32_0 = arith.constant 0 : i32
    return %arg0, %c0_i32 : i32, i32
  }
}

</mosaic_0001>

<bundles_post_ra>
// kernel: tpu_custom_call.1
= control target key start
LH: loop header
LB: loop body
LE: loop exit
PB: predicated region body
PF: predicated region fallthrough
CT: control target
= control target key end

     0   :  { %14 = vsyncpa [#allocation3], 0  ;;  %s1091_s0 = inlined_call_operand.hbm [shape: bf16[8,32], index: 0, kind: input, shape index: {}]   ;;  %s1092_s1 = inlined_call_operand.hbm [shape: bf16[32,256], index: 1, kind: input, shape index: {}]   ;;  %s1093_s2 = inlined_call_operand.vmem [shape: f32[1,256], index: 2, kind: input, shape index: {}]   ;;  %s1094_s3 = inlined_call_operand.hbm [shape: bf16[256,128], index: 3, kind: input, shape index: {}]   ;;  %s1095_s4 = inlined_call_operand.vmem [shape: f32[1,128], index: 4, kind: input, shape index: {}]   ;;  %s1096_s5 = inlined_call_operand.hbm [shape: bf16[128,128], index: 5, kind: input, shape index: {}]   ;;  %s1097_s6 = inlined_call_operand.vmem [shape: f32[1,128], index: 6, kind: input, shape index: {}]   ;;  %s1098_s7 = inlined_call_operand.hbm [shape: bf16[128,128], index: 7, kind: input, shape index: {}]   ;;  %s1099_s8 = inlined_call_operand.vmem [shape: f32[1,128], index: 8, kind: input, shape index: {}]   ;;  %s1100_s9 = inlined_call_operand.hbm [shape: f32[8,8], index: 9, kind: output, shape index: {}]  }
   0x1   :  { %15 = vsyncpa [#allocation6], 0 }
   0x2   :  { %16 = vsyncpa [#allocation9], 0 }
   0x3   :  { %17 = vsyncpa [#allocation4], 0  ;;  %s917_s30 = smov [#allocation5]   ;;  %s777_s13 = scalar_lea.hbm %s1092_s1, 512 }
   0x4   :  { %s33_s10 = sshll.u32 %s917_s30, 4  ;;  %p778_p0 = scmp.ne.s32.totalorder %s1092_s1, %s777_s13  ;;  %s34_s10 = int_to_ptr.vmem [resolvable:$true] %s33_s10 }
   0x5   :  { %p781_p1 = scmp.lt.u32.totalorder %s777_s13, %s1092_s1 }
   0x7   :  { %p783_p2 = pnand %p781_p1, %p778_p0 }
   0x9   :  { %786 = shalt.err (!%p783_p2)
}
   0xa   :  { %s787_s18 = scalar_lea.vmem %s34_s10, 512  ;;  %p792_p4 = scmp.lt.s32.totalorder %s34_s10, %s34_s10 }
   0xb   :  { %p788_p3 = scmp.ne.s32.totalorder %s34_s10, %s787_s18  ;;  %p793_p5 = scmp.lt.s32.totalorder %s787_s18, %s787_s18 }
   0xd   :  { %p794_p6 = por %p793_p5, %p792_p4 }
   0xf   :  { %p795_p7 = pnand %p794_p6, %p788_p3 }
  0x11   :  { %798 = shalt.err (!%p795_p7)
}
  0x12   :  { %s918_s19 = smov 128   ;;  %s919_s20 = smov 8  }
  0x13   :  { %39 = dma.hbm_to_vmem [thread:$0]  %s1092_s1, 512, %s34_s10, [#allocation6], %s918_s19, %s918_s19, %s919_s20  }
  0x14   :  { %s920_s23 = smov [#allocation8]   ;;  %s921_s25 = smov [#allocation2]  }
  0x15   :  { %s61_s24 = sshll.u32 %s920_s23, 4  ;;  %s24_s26 = sshll.u32 %s921_s25, 4  ;;  %s62_s24 = int_to_ptr.vmem [resolvable:$true] %s61_s24  ;;  %s25_s26 = int_to_ptr.vmem [resolvable:$true] %s24_s26 }
  0x16   :  { %s799_s29 = scalar_lea.hbm %s1096_s5, 1024 }
  0x17   :  { %p800_p8 = scmp.ne.s32.totalorder %s1096_s5, %s799_s29  ;;  %p803_p9 = scmp.lt.u32.totalorder %s799_s29, %s1096_s5 }
  0x19   :  { %p805_p10 = pnand %p803_p9, %p800_p8 }
  0x1b   :  { %808 = shalt.err (!%p805_p10)
}
  0x1c   :  { %s809_s1 = scalar_lea.vmem %s62_s24, 1024  ;;  %p814_p12 = scmp.lt.s32.totalorder %s62_s24, %s62_s24 }
  0x1d   :  { %p810_p11 = scmp.ne.s32.totalorder %s62_s24, %s809_s1  ;;  %p815_p13 = scmp.lt.s32.totalorder %s809_s1, %s809_s1 }
  0x1f   :  { %p816_p0 = por %p815_p13, %p814_p12 }
  0x21   :  { %p817_p1 = pnand %p816_p0, %p810_p11 }
  0x23   :  { %820 = shalt.err (!%p817_p1)
}
  0x24   :  { %s922_s10 = smov 64   ;;  %s923_s14 = smov 4  }
  0x25   :  { %67 = dma.hbm_to_vmem [thread:$0]  %s1096_s5, 1024, %s62_s24, [#allocation9], %s922_s10, %s922_s10, %s923_s14  }
  0x26   :  { %s821_s19 = scalar_lea.hbm %s1091_s0, 64 }
  0x27   :  { %p822_p2 = scmp.ne.s32.totalorder %s1091_s0, %s821_s19  ;;  %p825_p3 = scmp.lt.u32.totalorder %s821_s19, %s1091_s0 }
  0x29   :  { %p827_p4 = pnand %p825_p3, %p822_p2 }
  0x2b   :  { %830 = shalt.err (!%p827_p4)
}
  0x2c   :  { %s831_s25 = scalar_lea.vmem %s25_s26, 64  ;;  %p836_p6 = scmp.lt.s32.totalorder %s25_s26, %s25_s26 }
  0x2d   :  { %p832_p5 = scmp.ne.s32.totalorder %s25_s26, %s831_s25  ;;  %p837_p7 = scmp.lt.s32.totalorder %s831_s25, %s831_s25 }
  0x2f   :  { %p838_p8 = por %p837_p7, %p836_p6 }
  0x31   :  { %p839_p9 = pnand %p838_p8, %p832_p5 }
  0x33   :  { %842 = shalt.err (!%p839_p9)
}
  0x34   :  { %27 = dma.hbm_to_vmem [thread:$0]  %s1091_s0, 64, %s25_s26, [#allocation3]  }
  0x35   :  { %s924_s27 = smov [#allocation7]   ;;  %s925_s29 = smov [#allocation10]  }
  0x36   :  { %s47_s28 = sshll.u32 %s924_s27, 4  ;;  %s75_s30 = sshll.u32 %s925_s29, 4  ;;  %s48_s28 = int_to_ptr.vmem [resolvable:$true] %s47_s28  ;;  %s76_s30 = int_to_ptr.vmem [resolvable:$true] %s75_s30 }
  0x37   :  { %s843_s13 = scalar_lea.hbm %s1094_s3, 2048 }
  0x38   :  { %p844_p10 = scmp.ne.s32.totalorder %s1094_s3, %s843_s13  ;;  %p847_p11 = scmp.lt.u32.totalorder %s843_s13, %s1094_s3 }
  0x3a   :  { %p849_p12 = pnand %p847_p11, %p844_p10 }
  0x3c   :  { %852 = shalt.err (!%p849_p12)
}
  0x3d   :  { %s853_s0 = scalar_lea.vmem %s48_s28, 2048  ;;  %p858_p0 = scmp.lt.s32.totalorder %s48_s28, %s48_s28 }
  0x3e   :  { %p854_p13 = scmp.ne.s32.totalorder %s48_s28, %s853_s0  ;;  %p859_p1 = scmp.lt.s32.totalorder %s853_s0, %s853_s0 }
  0x40   :  { %p860_p2 = por %p859_p1, %p858_p0 }
  0x42   :  { %p861_p3 = pnand %p860_p2, %p854_p13 }
  0x44   :  { %864 = shalt.err (!%p861_p3)
}
  0x45   :  { %53 = dma.hbm_to_vmem [thread:$0]  %s1094_s3, 2048, %s48_s28, [#allocation6], %s922_s10, %s922_s10, %s923_s14  }
  0x46   :  { %s865_s21 = scalar_lea.hbm %s1098_s7, 1024 }
  0x47   :  { %p866_p4 = scmp.ne.s32.totalorder %s1098_s7, %s865_s21  ;;  %p869_p5 = scmp.lt.u32.totalorder %s865_s21, %s1098_s7 }
  0x49   :  { %p871_p6 = pnand %p869_p5, %p866_p4 }
  0x4b   :  { %874 = shalt.err (!%p871_p6)
}
  0x4c   :  { %s875_s24 = scalar_lea.vmem %s76_s30, 1024  ;;  %p880_p8 = scmp.lt.s32.totalorder %s76_s30, %s76_s30 }
  0x4d   :  { %p876_p7 = scmp.ne.s32.totalorder %s76_s30, %s875_s24  ;;  %p881_p9 = scmp.lt.s32.totalorder %s875_s24, %s875_s24 }
  0x4f   :  { %p882_p10 = por %p881_p9, %p880_p8 }
  0x51   :  { %p883_p11 = pnand %p882_p10, %p876_p7 }
  0x53   :  { %886 = shalt.err (!%p883_p11)
}
  0x54   :  { %81 = dma.hbm_to_vmem [thread:$0]  %s1098_s7, 1024, %s76_s30, [#allocation9], %s922_s10, %s922_s10, %s923_s14  }
  0x55   :  { %909 = dma.done.wait [#allocation3], 64  }
  0x56   :  { %910 = vsyncadd [#allocation3], 4294967232 }
  0x57   :  { %911 = dma.done.wait [#allocation6], 2560  }
  0x58   :  { %912 = vsyncadd [#allocation6], 4294964736 }
  0x59   :  { %913 = dma.done.wait [#allocation9], 2048  }
  0x5a   :  { %914 = vsyncadd [#allocation9], 4294965248  ;;  %v926_v0 = vmov 0   ;;  %v739_v1 = vld [vmem:[#allocation5 + $0x4] ss:$8 sps:$4 sm:$0xff]   ;;  %vm137_vm0 = vcmask 261120   ;;  %v107_v29 = vlaneseq }
  0x5b   :  { %173 = vmatprep.mubr.bf16.mxu0 %v926_v0  ;;  %v741_v2 = vld [vmem:[#allocation5] ss:$8 sps:$4 sm:$0xff]   ;;  %141 = vmatprep.subr.bf16.mxu0 %v739_v1  ;;  %v742_v3 = vld [vmem:[#allocation5 + $0x14] ss:$8 sps:$4 sm:$0xff]   ;;  %v744_v4 = vld [vmem:[#allocation5 + $0x10] ss:$8 sps:$4 sm:$0xff]  }
  0x5c   :  { %142 = vmatpush1.bf16.msra.mxu0 %v741_v2  ;;  %v745_v5 = vld [vmem:[#allocation7 + $0x40] sm:$0xff]   ;;  %v100_v7 = vld [vmem:[#allocation2] sm:$0xf]  ;;  %v747_v8 = vld [vmem:[#allocation7 + $0x48] sm:$0xff]   ;;  %v927_v23 = vmov 0.0   ;;  %v108_v30 = vshrl.u32 %v107_v29, 7 }
  0x5d   :  { %143 = vmatprep.subr.bf16.mxu0 %v742_v3  ;;  %v746_v6 = vld [vmem:[#allocation7] sm:$0xff]   ;;  %646 = vmatprep.subr.bf16.mxu1 %v745_v5  ;;  %v748_v9 = vld [vmem:[#allocation7 + $0x8] sm:$0xff]   ;;  %v749_v10 = vld [vmem:[#allocation7 + $0x50] sm:$0xff]   ;;  %vm928_vm1 = vmmov 0   ;;  %s929_s11 = smov [#allocation11]   ;;  %vm587_vm2 = vcmask 64512  }
  0x5e   :  { %647 = vmatpush3.bf16.msra.mxu1 %v746_v6  ;;  %v750_v11 = vld [vmem:[#allocation7 + $0x10] sm:$0xff]   ;;  %v751_v12 = vld [vmem:[#allocation7 + $0x58] sm:$0xff]   ;;  %v753_v14 = vld [vmem:[#allocation7 + $0x60] sm:$0xff]   ;;  %v109_v31 = vsub.s32 0, %v108_v30  ;;  %v113_v33 = vsub.s32 1, %v108_v30  ;;  %s595_s12 = sshll.u32 %s929_s11, 4  ;;  %s596_s12 = int_to_ptr.vmem [resolvable:$true] %s595_s12 }
  0x5f   :  { %648 = vmatprep.subr.bf16.mxu1 %v747_v8  ;;  %v752_v13 = vld [vmem:[#allocation7 + $0x18] sm:$0xff]   ;;  %v754_v15 = vld [vmem:[#allocation7 + $0x20] sm:$0xff]   ;;  %v755_v16 = vld [vmem:[#allocation7 + $0x68] sm:$0xff]   ;;  %p892_p13 = scmp.lt.s32.totalorder %s596_s12, %s596_s12 }
  0x60   :  { %144 = vmatpush1.bf16.msra.mxu0 %v744_v4  ;;  %v756_v17 = vld [vmem:[#allocation7 + $0x28] sm:$0xff]   ;;  %v757_v18 = vld [vmem:[#allocation7 + $0x70] sm:$0xff]   ;;  %v759_v20 = vld [vmem:[#allocation7 + $0x78] sm:$0xff]  }
  0x61   :  { %v758_v19 = vld [vmem:[#allocation7 + $0x30] sm:$0xff]   ;;  %v760_v21 = vld [vmem:[#allocation7 + $0x38] sm:$0xff]   ;;  %v761_v22 = vld [vmem:[#allocation8] sm:$0xff]   ;;  %686 = vmatprep.subr.bf16.mxu0 %v927_v23 }
  0x62   :  { %649 = vmatpush3.bf16.msra.mxu1 %v748_v9  ;;  %v762_v24 = vld [vmem:[#allocation8 + $0x8] sm:$0xff]   ;;  %v763_v25 = vld [vmem:[#allocation8 + $0x10] sm:$0xff]   ;;  %v764_v26 = vld [vmem:[#allocation8 + $0x18] sm:$0xff]  }
  0x63   :  { %610 = vmatmul.mubr.msk.bf16.vlgmr.msra.gmra.mrb[0].mxu0 %vm137_vm0, %v100_v7  ;;  %650 = vmatprep.subr.bf16.mxu1 %v749_v10  ;;  %v765_v27 = vld [vmem:[#allocation8 + $0x20] sm:$0xff]   ;;  %v766_v28 = vld [vmem:[#allocation8 + $0x28] sm:$0xff]   ;;  %v105_v32 = vld [vmem:[%s1093_s2] sm:$0x3] }
  0x64   :  { %687 = vmatpush3.bf16.msra.mxu0 %v761_v22  ;;  %v110_v34 = vrot.slane %v105_v32, %v109_v31  ;;  %v114_v35 = vrot.slane %v105_v32, %v113_v33  ;;  %v767_v46 = vld [vmem:[#allocation8 + $0x30] sm:$0xff]   ;;  %v768_v47 = vld [vmem:[#allocation8 + $0x38] sm:$0xff]   ;;  %702 = vmatprep.mubr.msk.bf16.mxu0 %vm928_vm1, %v927_v23  ;;  %v769_v48 = vld [vmem:[#allocation10] sm:$0xff]  }
  0x65   :  { %688 = vmatprep.subr.bf16.mxu0 %v927_v23  ;;  %v770_v49 = vld [vmem:[#allocation10 + $0x8] sm:$0xff]   ;;  %v771_v50 = vld [vmem:[#allocation10 + $0x10] sm:$0xff]   ;;  %v772_v51 = vld [vmem:[#allocation10 + $0x18] sm:$0xff]  }
  0x66   :  { %651 = vmatpush3.bf16.msra.mxu1 %v750_v11  ;;  %v773_v52 = vld [vmem:[#allocation10 + $0x20] sm:$0xff]   ;;  %v774_v53 = vld [vmem:[#allocation10 + $0x28] sm:$0xff]   ;;  %v611_v55 = vld [vmem:[%s1095_s4] ss:$0 sm:$0xff] }
  0x67   :  { %652 = vmatprep.subr.bf16.mxu1 %v751_v12  ;;  %v775_v63 = vld [vmem:[#allocation10 + $0x30] sm:$0xff]   ;;  %v776_v0 = vld [vmem:[#allocation10 + $0x38] sm:$0xff]  }
  0x68   :  { %689 = vmatpush3.bf16.msra.mxu0 %v762_v24  ;;  %v628_v1 = vld [vmem:[%s1097_s6] ss:$0 sm:$0xff]  ;;  %s887_s6 = scalar_lea.vmem %s596_s12, 128 }
  0x69   :  { %690 = vmatprep.subr.bf16.mxu0 %v927_v23  ;;  %v637_v9 = vld [vmem:[%s1099_s8] ss:$0 sm:$0xff]  ;;  %p888_p12 = scmp.ne.s32.totalorder %s596_s12, %s887_s6  ;;  %p893_p0 = scmp.lt.s32.totalorder %s887_s6, %s887_s6 }
  0x6a   :  { %653 = vmatpush3.bf16.msra.mxu1 %v752_v13 }
  0x6b   :  { %654 = vmatprep.subr.bf16.mxu1 %v753_v14  ;;  %p894_p1 = por %p893_p0, %p892_p13 }
  0x6c   :  { %691 = vmatpush3.bf16.msra.mxu0 %v763_v25 }
  0x6d   :  { %692 = vmatprep.subr.bf16.mxu0 %v927_v23  ;;  %p895_p2 = pnand %p894_p1, %p888_p12 }
  0x6e   :  { %655 = vmatpush3.bf16.msra.mxu1 %v754_v15 }
  0x6f   :  { %656 = vmatprep.subr.bf16.mxu1 %v755_v16 }
  0x70   :  { %693 = vmatpush3.bf16.msra.mxu0 %v764_v26 }
  0x71   :  { %694 = vmatprep.subr.bf16.mxu0 %v927_v23 }
  0x72   :  { %657 = vmatpush3.bf16.msra.mxu1 %v756_v17 }
  0x73   :  { %658 = vmatprep.subr.bf16.mxu1 %v757_v18 }
  0x74   :  { %695 = vmatpush3.bf16.msra.mxu0 %v765_v27 }
  0x75   :  { %696 = vmatprep.subr.bf16.mxu0 %v927_v23 }
  0x76   :  { %659 = vmatpush3.bf16.msra.mxu1 %v758_v19 }
  0x77   :  { %660 = vmatprep.subr.bf16.mxu1 %v759_v20 }
  0x78   :  { %697 = vmatpush3.bf16.msra.mxu0 %v766_v28 }
  0x79   :  { %698 = vmatprep.subr.bf16.mxu0 %v927_v23 }
  0x7a   :  { %661 = vmatpush3.bf16.msra.mxu1 %v760_v21 }
  0x7b   :  { %706 = vmatprep.subr.bf16.mxu1 %v927_v23 }
  0x7c   :  { %699 = vmatpush3.bf16.msra.mxu0 %v767_v46 }
  0x7d   :  { %700 = vmatprep.subr.bf16.mxu0 %v927_v23 }
  0x80   :  { %701 = vmatpush3.bf16.msra.mxu0 %v768_v47 }
 0x136   :  { %v175_v36 = vpop.f32.mrb[0].mxu0 }
 0x137   :  { %v176_v37 = vadd.f32 %v175_v36, %v110_v34  ;;  %v177_v38 = vpop.f32.mrb[1].mxu0 }
 0x138   :  { %v178_v39 = vadd.f32 %v177_v38, %v114_v35  ;;  %v179_v40 = vpop.f32.mrb[2].mxu0 }
 0x139   :  { %v182_v41 = vmax.f32 %v176_v37, 0.0  ;;  %v180_v42 = vpop.f32.mrb[3].mxu0 }
 0x13a   :  { %v183_v43 = vmax.f32 %v178_v39, 0.0 }
 0x13b   :  { %v184_v45 = vpack.c.bf16 %v182_v41, %v182_v41 }
 0x13c   :  { %v185_v44 = vpack.c.bf16 %v183_v43, %v183_v43 }
 0x13e   :  { %353 = vmatprep.mubr.bf16.mxu1 %v185_v44 }
 0x13f   :  { %354 = vmatmul.mubr.bf16.vlgmr.msra.gmra.mrb[0].mxu1 %v184_v45 }
 0x140   :  { %722 = vmatprep.mubr.msk.bf16.mxu1 %vm928_vm1, %v927_v23  ;;  %707 = vmatpush3.bf16.msra.mxu1 %v769_v48 }
 0x141   :  { %708 = vmatprep.subr.bf16.mxu1 %v927_v23 }
 0x144   :  { %709 = vmatpush3.bf16.msra.mxu1 %v770_v49 }
 0x145   :  { %710 = vmatprep.subr.bf16.mxu1 %v927_v23 }
 0x148   :  { %711 = vmatpush3.bf16.msra.mxu1 %v771_v50 }
 0x149   :  { %712 = vmatprep.subr.bf16.mxu1 %v927_v23 }
 0x14c   :  { %713 = vmatpush3.bf16.msra.mxu1 %v772_v51 }
 0x14d   :  { %714 = vmatprep.subr.bf16.mxu1 %v927_v23 }
 0x150   :  { %715 = vmatpush3.bf16.msra.mxu1 %v773_v52 }
 0x151   :  { %716 = vmatprep.subr.bf16.mxu1 %v927_v23 }
 0x154   :  { %717 = vmatpush3.bf16.msra.mxu1 %v774_v53 }
 0x155   :  { %718 = vmatprep.subr.bf16.mxu1 %v927_v23 }
 0x158   :  { %719 = vmatpush3.bf16.msra.mxu1 %v775_v63 }
 0x159   :  { %720 = vmatprep.subr.bf16.mxu1 %v927_v23 }
 0x15c   :  { %721 = vmatpush3.bf16.msra.mxu1 %v776_v0 }
 0x212   :  { %v662_v54 = vpop.f32.mrb[0].mxu1 }
 0x213   :  { %v663_v56 = vpop.f32.mrb[1].mxu1 }
 0x214   :  { %v664_v57 = vadd.f32 %v663_v56, %v662_v54  ;;  %v665_v58 = vpop.f32.mrb[2].mxu1 }
 0x215   :  { %v666_v59 = vpop.f32.mrb[3].mxu1 }
 0x216   :  { %v356_v60 = vadd.f32 %v664_v57, %v611_v55 }
 0x218   :  { %v361_v61 = vmax.f32 %v356_v60, 0.0 }
 0x21a   :  { %v362_v62 = vpack.c.bf16 %v361_v61, %v361_v61 }
 0x21c   :  { %703 = vmatmul.mubr.bf16.vlgmr.msra.gmra.mrb[4].mxu0 %v362_v62 }
 0x2ef   :  { %v468_v2 = vpop.f32.mrb[4].mxu0 }
 0x2f0   :  { %v469_v3 = vadd.f32 %v628_v1, %v468_v2  ;;  %v704_v4 = vpop.f32.mrb[5].mxu0 }
 0x2f1   :  { %v471_v5 = vpop.f32.mrb[6].mxu0 }
 0x2f2   :  { %v474_v6 = vmax.f32 %v469_v3, 0.0  ;;  %v705_v7 = vpop.f32.mrb[7].mxu0 }
 0x2f4   :  { %v475_v8 = vpack.c.bf16 %v474_v6, %v474_v6 }
 0x2f6   :  { %723 = vmatmul.mubr.bf16.vlgmr.msra.gmra.mrb[4].mxu1 %v475_v8 }
 0x3c9   :  { %v581_v10 = vpop.f32.mrb[4].mxu1 }
 0x3ca   :  { %v582_v11 = vadd.f32 %v637_v9, %v581_v10  ;;  %v724_v12 = vpop.f32.mrb[5].mxu1 }
 0x3cb   :  { %v584_v13 = vpop.f32.mrb[6].mxu1 }
 0x3cc   :  { %v725_v14 = vpop.f32.mrb[7].mxu1  ;;  %588 = vst.msk [vmem:[#allocation11] sm:$0xff] %vm587_vm2, %v582_v11 }
 0x3cd   :  { %898 = shalt.err (!%p895_p2)
}
 0x3ce   :  { %s899_s8 = scalar_lea.hbm %s1100_s9, 128 }
 0x3cf   :  { %p900_p3 = scmp.ne.s32.totalorder %s1100_s9, %s899_s8  ;;  %p903_p4 = scmp.lt.u32.totalorder %s899_s8, %s1100_s9 }
 0x3d1   :  { %p905_p5 = pnand %p903_p4, %p900_p3 }
 0x3d3   :  { %908 = shalt.err (!%p905_p5)
}
 0x3d4   :  { %598 = dma.vmem_to_hbm [thread:$0]  %s596_s12, 128, %s1100_s9, [#allocation4]  }
 0x3d5   :  { %915 = dma.done.wait [#allocation4], 128  }
 0x3d6   :  { %916 = vsyncadd [#allocation4], 4294967168 }
 0x3d7   :  { %602 = vsyncpa [#allocation3], 1 }
 0x3d8   :  { %603 = vsyncpa [#allocation6], 1 }
 0x3d9   :  { %604 = vsyncpa [#allocation9], 1 }
 0x3da   :  { %605 = vsyncpa [#allocation4], 1 }

</bundles_post_ra>
